<compile_context>
chip_gen: v6e
topology: v6e:2x2x1
jax: 0.10.0
libtpu: 0.0.40
codegen_flags: <defaults>
</compile_context>

<pallas_src>
import jax
import jax.numpy as jnp
from jax import lax
from jax.experimental import pallas as pl
from jax.experimental.pallas import tpu as pltpu

EPS = 1e-5
PAD = 8  # tile-aligned (multiple-of-8) sublane offset of the interior inside the H-padded scratch


def _vmem_spec():
    return pl.BlockSpec(memory_space=pltpu.MemorySpace.VMEM)


# ---------------------------------------------------------------------------
# Fused kernel: conv1 + relu -> conv2 + bias + residual -> BN(batch stats) + relu
# ---------------------------------------------------------------------------
def _residual_fused_kernel(x_ref, b1m_ref, b1v_ref, b2m_ref, b2v_ref,
                           g_ref, gt_ref, gamma_ref, beta_ref,
                           o_ref, xs_ref, hs_ref):
    # x_ref   : (N, H, W*Cin)           input, lane-dense
    # b?m_ref : (3, W*Cin, W*Cout)      per-height-tap banded weight matrices
    # b?v_ref : (1, W*Cout)             bias tiled over w
    # g_ref   : (W*Cout, Cout)          one-hot channel projection, gt_ref = its transpose
    # o_ref   : (N*H, W*Cout)           lane-dense output slab
    # xs_ref, hs_ref : (N, H+PAD+1, W*C) VMEM scratch holding the H-zero-padded activations
    N, HP, WCin = xs_ref.shape
    H = HP - (PAD + 1)
    WCout = hs_ref.shape[2]
    Cout = g_ref.shape[1]
    NH = N * H

    # ---- in-kernel zero padding along H (the W halo is folded into the banded weights,
    #      so no W padding is needed at all).  Interior store is tile-aligned (offset 8). ----
    xs_ref[...] = jnp.zeros_like(xs_ref)
    xs_ref[:, PAD:PAD + H, :] = x_ref[...]

    def conv3x3(src_ref, bmat_ref, bias_ref):
        src = src_ref[...]                      # (N, H+PAD+1, W*Cin), zero halo at rows PAD-1, PAD+H
        acc = jnp.zeros((NH, bmat_ref.shape[2]), jnp.float32)
        for dy in range(3):                     # 3 height taps -> 3 K=W*Cin matmuls on the MXU
            win = src[:, PAD - 1 + dy:PAD - 1 + dy + H, :].reshape(NH, -1)
            acc = acc + jnp.dot(win, bmat_ref[dy], preferred_element_type=jnp.float32)
        return acc + bias_ref[...]

    # conv1 + bias + relu (h1 stays entirely in VMEM)
    h1 = jnp.maximum(conv3x3(xs_ref, b1m_ref, b1v_ref), 0.0)

    hs_ref[...] = jnp.zeros_like(hs_ref)
    hs_ref[:, PAD:PAD + H, :] = h1.reshape(N, H, WCout)

    # conv2 + bias + identity residual (same_shape=True -> Cin == Cout)
    pre = conv3x3(hs_ref, b2m_ref, b2v_ref) + x_ref[...].reshape(NH, WCin)

    # BatchNorm2d, training mode: biased batch statistics over (N, H, W), per channel.
    # Channels are interleaved along lanes as (w, c); reduce/broadcast per channel via the
    # one-hot projection G and its transpose (tiny matmuls, no lane-strided reshapes).
    cnt = float(NH * (WCout // Cout))
    s1 = jnp.broadcast_to(jnp.sum(pre, axis=0, keepdims=True), (8, WCout))
    s2 = jnp.broadcast_to(jnp.sum(pre * pre, axis=0, keepdims=True), (8, WCout))
    sum_c = jnp.dot(s1, g_ref[...], preferred_element_type=jnp.float32)     # (8, Cout)
    sumsq_c = jnp.dot(s2, g_ref[...], preferred_element_type=jnp.float32)   # (8, Cout)
    mean_c = sum_c * (1.0 / cnt)
    var_c = sumsq_c * (1.0 / cnt) - mean_c * mean_c
    inv_c = lax.rsqrt(var_c + EPS)
    scale_c = gamma_ref[...] * inv_c                                        # (8, Cout)
    shift_c = beta_ref[...] - mean_c * scale_c                              # (8, Cout)
    scale_l = jnp.dot(scale_c, gt_ref[...], preferred_element_type=jnp.float32)[0:1]  # (1, W*Cout)
    shift_l = jnp.dot(shift_c, gt_ref[...], preferred_element_type=jnp.float32)[0:1]  # (1, W*Cout)

    o_ref[...] = jnp.maximum(pre * scale_l + shift_l, 0.0)


# ---------------------------------------------------------------------------
# Wrapper: layout plumbing + weight folding (hot path is the single fused kernel)
# ---------------------------------------------------------------------------
def _band_weights(w_hwio, width):
    """Fold the 3 width taps + channel mixing of a 3x3 'SAME' conv into, per height tap dy,
    a banded (W*Cin, W*Cout) matrix.  The width zero-padding becomes implicit (out-of-band
    entries are simply absent)."""
    KH, KW, Cin, Cout = w_hwio.shape
    w_in = jnp.arange(width)[:, None]
    w_out = jnp.arange(width)[None, :]
    dx = w_in - w_out + 1                                        # which width tap connects w_in -> w_out
    valid = ((dx >= 0) & (dx < KW)).astype(w_hwio.dtype)         # (W, W)
    taps = w_hwio[:, jnp.clip(dx, 0, KW - 1)]                    # (KH, W, W, Cin, Cout)
    taps = taps * valid[None, :, :, None, None]
    return taps.transpose(0, 1, 3, 2, 4).reshape(KH, width * Cin, width * Cout)


def residual_forward(x_nchw, params):
    x = jnp.transpose(x_nchw, (0, 2, 3, 1)).astype(jnp.float32)  # NCHW -> NHWC
    N, H, W, Cin = x.shape
    Cout = params["w2"].shape[-1]
    assert Cin == Cout, "same_shape=True Residual uses an identity skip"

    B1 = _band_weights(params["w1"], W)                          # (3, W*Cin, W*Cin)
    B2 = _band_weights(params["w2"], W)                          # (3, W*Cin, W*Cout)
    b1_lane = jnp.tile(params["b1"], (1, W))                     # (1, W*Cin)
    b2_lane = jnp.tile(params["b2"], (1, W))                     # (1, W*Cout)
    G = jnp.tile(jnp.eye(Cout, dtype=jnp.float32), (W, 1))       # (W*Cout, Cout)
    Gt = G.T                                                     # (Cout, W*Cout)

    x_flat = x.reshape(N, H, W * Cin)                            # lane-dense input slab

    out_flat = pl.pallas_call(
        _residual_fused_kernel,
        out_shape=jax.ShapeDtypeStruct((N * H, W * Cout), jnp.float32),
        in_specs=[_vmem_spec() for _ in range(9)],
        out_specs=_vmem_spec(),
        scratch_shapes=[
            pltpu.VMEM((N, H + PAD + 1, W * Cin), jnp.float32),  # H-padded x
            pltpu.VMEM((N, H + PAD + 1, W * Cout), jnp.float32), # H-padded h1
        ],
    )(x_flat, B1, b1_lane, B2, b2_lane, G, Gt, params["gamma"], params["beta"])

    y = out_flat.reshape(N, H, W, Cout)
    return jnp.transpose(y, (0, 3, 1, 2))                        # NHWC -> NCHW


# ---------------------------------------------------------------------------
# Pure-JAX reference for verification
# ---------------------------------------------------------------------------
def residual_reference(x_nchw, params):
    x = jnp.transpose(x_nchw, (0, 2, 3, 1)).astype(jnp.float32)
    dn = ("NHWC", "HWIO", "NHWC")
    h1 = lax.conv_general_dilated(x, params["w1"], (1, 1), "SAME",
                                  dimension_numbers=dn) + params["b1"][0]
    h1 = jnp.maximum(h1, 0.0)
    pre = lax.conv_general_dilated(h1, params["w2"], (1, 1), "SAME",
                                   dimension_numbers=dn) + params["b2"][0]
    pre = pre + x
    mean = jnp.mean(pre, axis=(0, 1, 2), keepdims=True)
    var = jnp.mean((pre - mean) ** 2, axis=(0, 1, 2), keepdims=True)
    y = (pre - mean) * lax.rsqrt(var + EPS) * params["gamma"][0] + params["beta"][0]
    y = jnp.maximum(y, 0.0)
    return jnp.transpose(y, (0, 3, 1, 2))


if __name__ == "__main__":
    # Small shapes: batch=2, in_channels=out_channels=4, spatial=16 (same_shape=True)
    N, C_IN, C_OUT, H, W = 2, 4, 4, 16, 16

    key = jax.random.PRNGKey(0)
    kx, kw1, kb1, kw2, kb2 = jax.random.split(key, 5)

    x = jax.random.normal(kx, (N, C_IN, H, W), dtype=jnp.float32)

    params = {
        "w1": 0.1 * jax.random.normal(kw1, (3, 3, C_IN, C_IN), dtype=jnp.float32),
        "b1": 0.1 * jax.random.normal(kb1, (1, C_IN), dtype=jnp.float32),
        "w2": 0.1 * jax.random.normal(kw2, (3, 3, C_IN, C_OUT), dtype=jnp.float32),
        "b2": 0.1 * jax.random.normal(kb2, (1, C_OUT), dtype=jnp.float32),
        "gamma": jnp.ones((1, C_OUT), dtype=jnp.float32),   # BatchNorm2d default init
        "beta": jnp.zeros((1, C_OUT), dtype=jnp.float32),
    }

    out = jax.block_until_ready(residual_forward(x, params))
    ref = jax.block_until_ready(residual_reference(x, params))

    assert out.shape == (N, C_OUT, H, W), out.shape
    err = float(jnp.max(jnp.abs(out - ref)))
    assert jnp.allclose(out, ref, atol=2e-4, rtol=2e-4), err

    print("KERNEL_OK")
</pallas_src>

<mosaic_0001>
module attributes {stable_mosaic.version = 11 : i64} {
  func.func @_residual_fused_kernel(%arg0: memref<2x16x64xf32, #tpu.memory_space<vmem>>, %arg1: memref<3x64x64xf32, #tpu.memory_space<vmem>>, %arg2: memref<1x64xf32, #tpu.memory_space<vmem>>, %arg3: memref<3x64x64xf32, #tpu.memory_space<vmem>>, %arg4: memref<1x64xf32, #tpu.memory_space<vmem>>, %arg5: memref<64x4xf32, #tpu.memory_space<vmem>>, %arg6: memref<4x64xf32, #tpu.memory_space<vmem>>, %arg7: memref<1x4xf32, #tpu.memory_space<vmem>>, %arg8: memref<1x4xf32, #tpu.memory_space<vmem>>, %arg9: memref<32x64xf32, #tpu.memory_space<vmem>>, %arg10: memref<2x25x64xf32, #tpu.memory_space<vmem>>, %arg11: memref<2x25x64xf32, #tpu.memory_space<vmem>>) attributes {dimension_semantics = [], scalar_prefetch = 0 : i64, scratch_operands = 2 : i64, tpu.core_type = #tpu.core_type<tc>} {
    %cst = arith.constant 0.000000e+00 : f32
    %0 = vector.broadcast %cst : f32 to vector<2x25x64xf32>
    %c0 = arith.constant 0 : index
    %c0_0 = arith.constant 0 : index
    %c0_1 = arith.constant 0 : index
    %1 = vector.load %arg10[%c0, %c0_0, %c0_1] : memref<2x25x64xf32, #tpu.memory_space<vmem>>, vector<2x25x64xf32>
    tpu.vector_store %arg10[%c0, %c0_0, %c0_1], %0 {strides = array<i32>} : memref<2x25x64xf32, #tpu.memory_space<vmem>>, vector<2x25x64xf32>,
    %c0_2 = arith.constant 0 : index
    %c0_3 = arith.constant 0 : index
    %c0_4 = arith.constant 0 : index
    %2 = vector.load %arg0[%c0_2, %c0_3, %c0_4] : memref<2x16x64xf32, #tpu.memory_space<vmem>>, vector<2x16x64xf32>
    %c0_5 = arith.constant 0 : index
    %c8 = arith.constant 8 : index
    %c0_6 = arith.constant 0 : index
    %3 = vector.load %arg10[%c0_5, %c8, %c0_6] : memref<2x25x64xf32, #tpu.memory_space<vmem>>, vector<2x16x64xf32>
    tpu.vector_store %arg10[%c0_5, %c8, %c0_6], %2 {strides = array<i32>} : memref<2x25x64xf32, #tpu.memory_space<vmem>>, vector<2x16x64xf32>,
    %c0_7 = arith.constant 0 : index
    %c0_8 = arith.constant 0 : index
    %c0_9 = arith.constant 0 : index
    %4 = vector.load %arg10[%c0_7, %c0_8, %c0_9] : memref<2x25x64xf32, #tpu.memory_space<vmem>>, vector<2x25x64xf32>
    %cst_10 = arith.constant 0.000000e+00 : f32
    %5 = vector.broadcast %cst_10 : f32 to vector<32x64xf32>
    %6 = vector.extract_strided_slice %4 {offsets = [0, 7, 0], sizes = [2, 16, 64], strides = [1, 1, 1]} : vector<2x25x64xf32> to vector<2x16x64xf32>
    %7 = vector.shape_cast %6 : vector<2x16x64xf32> to vector<32x64xf32>
    %c0_11 = arith.constant 0 : index
    %c0_12 = arith.constant 0 : index
    %c0_13 = arith.constant 0 : index
    %8 = vector.load %arg1[%c0_11, %c0_12, %c0_13] : memref<3x64x64xf32, #tpu.memory_space<vmem>>, vector<1x64x64xf32>
    %9 = vector.shape_cast %8 : vector<1x64x64xf32> to vector<64x64xf32>
    %cst_14 = arith.constant dense<0.000000e+00> : vector<32x64xf32>
    %10 = tpu.matmul %7, %9, %cst_14 {dimension_numbers = #tpu.dot_dimension_numbers<[1], [0], [0], [1], [0, 0, 1, 1], [], []>} : vector<32x64xf32>, vector<64x64xf32>, vector<32x64xf32> -> vector<32x64xf32>
    %11 = arith.addf %5, %10 : vector<32x64xf32>
    %12 = vector.extract_strided_slice %4 {offsets = [0, 8, 0], sizes = [2, 16, 64], strides = [1, 1, 1]} : vector<2x25x64xf32> to vector<2x16x64xf32>
    %13 = vector.shape_cast %12 : vector<2x16x64xf32> to vector<32x64xf32>
    %c1 = arith.constant 1 : index
    %c0_15 = arith.constant 0 : index
    %c0_16 = arith.constant 0 : index
    %14 = vector.load %arg1[%c1, %c0_15, %c0_16] : memref<3x64x64xf32, #tpu.memory_space<vmem>>, vector<1x64x64xf32>
    %15 = vector.shape_cast %14 : vector<1x64x64xf32> to vector<64x64xf32>
    %cst_17 = arith.constant dense<0.000000e+00> : vector<32x64xf32>
    %16 = tpu.matmul %13, %15, %cst_17 {dimension_numbers = #tpu.dot_dimension_numbers<[1], [0], [0], [1], [0, 0, 1, 1], [], []>} : vector<32x64xf32>, vector<64x64xf32>, vector<32x64xf32> -> vector<32x64xf32>
    %17 = arith.addf %11, %16 : vector<32x64xf32>
    %18 = vector.extract_strided_slice %4 {offsets = [0, 9, 0], sizes = [2, 16, 64], strides = [1, 1, 1]} : vector<2x25x64xf32> to vector<2x16x64xf32>
    %19 = vector.shape_cast %18 : vector<2x16x64xf32> to vector<32x64xf32>
    %c2 = arith.constant 2 : index
    %c0_18 = arith.constant 0 : index
    %c0_19 = arith.constant 0 : index
    %20 = vector.load %arg1[%c2, %c0_18, %c0_19] : memref<3x64x64xf32, #tpu.memory_space<vmem>>, vector<1x64x64xf32>
    %21 = vector.shape_cast %20 : vector<1x64x64xf32> to vector<64x64xf32>
    %cst_20 = arith.constant dense<0.000000e+00> : vector<32x64xf32>
    %22 = tpu.matmul %19, %21, %cst_20 {dimension_numbers = #tpu.dot_dimension_numbers<[1], [0], [0], [1], [0, 0, 1, 1], [], []>} : vector<32x64xf32>, vector<64x64xf32>, vector<32x64xf32> -> vector<32x64xf32>
    %23 = arith.addf %17, %22 : vector<32x64xf32>
    %c0_21 = arith.constant 0 : index
    %c0_22 = arith.constant 0 : index
    %24 = vector.load %arg2[%c0_21, %c0_22] : memref<1x64xf32, #tpu.memory_space<vmem>>, vector<1x64xf32>
    %25 = vector.broadcast %24 : vector<1x64xf32> to vector<32x64xf32>
    %26 = arith.addf %23, %25 : vector<32x64xf32>
    %cst_23 = arith.constant 0.000000e+00 : f32
    %27 = vector.broadcast %cst_23 : f32 to vector<32x64xf32>
    %28 = arith.maximumf %26, %27 : vector<32x64xf32>
    %cst_24 = arith.constant 0.000000e+00 : f32
    %29 = vector.broadcast %cst_24 : f32 to vector<2x25x64xf32>
    %c0_25 = arith.constant 0 : index
    %c0_26 = arith.constant 0 : index
    %c0_27 = arith.constant 0 : index
    %30 = vector.load %arg11[%c0_25, %c0_26, %c0_27] : memref<2x25x64xf32, #tpu.memory_space<vmem>>, vector<2x25x64xf32>
    tpu.vector_store %arg11[%c0_25, %c0_26, %c0_27], %29 {strides = array<i32>} : memref<2x25x64xf32, #tpu.memory_space<vmem>>, vector<2x25x64xf32>,
    %31 = vector.shape_cast %28 : vector<32x64xf32> to vector<2x16x64xf32>
    %c0_28 = arith.constant 0 : index
    %c8_29 = arith.constant 8 : index
    %c0_30 = arith.constant 0 : index
    %32 = vector.load %arg11[%c0_28, %c8_29, %c0_30] : memref<2x25x64xf32, #tpu.memory_space<vmem>>, vector<2x16x64xf32>
    tpu.vector_store %arg11[%c0_28, %c8_29, %c0_30], %31 {strides = array<i32>} : memref<2x25x64xf32, #tpu.memory_space<vmem>>, vector<2x16x64xf32>,
    %c0_31 = arith.constant 0 : index
    %c0_32 = arith.constant 0 : index
    %c0_33 = arith.constant 0 : index
    %33 = vector.load %arg11[%c0_31, %c0_32, %c0_33] : memref<2x25x64xf32, #tpu.memory_space<vmem>>, vector<2x25x64xf32>
    %cst_34 = arith.constant 0.000000e+00 : f32
    %34 = vector.broadcast %cst_34 : f32 to vector<32x64xf32>
    %35 = vector.extract_strided_slice %33 {offsets = [0, 7, 0], sizes = [2, 16, 64], strides = [1, 1, 1]} : vector<2x25x64xf32> to vector<2x16x64xf32>
    %36 = vector.shape_cast %35 : vector<2x16x64xf32> to vector<32x64xf32>
    %c0_35 = arith.constant 0 : index
    %c0_36 = arith.constant 0 : index
    %c0_37 = arith.constant 0 : index
    %37 = vector.load %arg3[%c0_35, %c0_36, %c0_37] : memref<3x64x64xf32, #tpu.memory_space<vmem>>, vector<1x64x64xf32>
    %38 = vector.shape_cast %37 : vector<1x64x64xf32> to vector<64x64xf32>
    %cst_38 = arith.constant dense<0.000000e+00> : vector<32x64xf32>
    %39 = tpu.matmul %36, %38, %cst_38 {dimension_numbers = #tpu.dot_dimension_numbers<[1], [0], [0], [1], [0, 0, 1, 1], [], []>} : vector<32x64xf32>, vector<64x64xf32>, vector<32x64xf32> -> vector<32x64xf32>
    %40 = arith.addf %34, %39 : vector<32x64xf32>
    %41 = vector.extract_strided_slice %33 {offsets = [0, 8, 0], sizes = [2, 16, 64], strides = [1, 1, 1]} : vector<2x25x64xf32> to vector<2x16x64xf32>
    %42 = vector.shape_cast %41 : vector<2x16x64xf32> to vector<32x64xf32>
    %c1_39 = arith.constant 1 : index
    %c0_40 = arith.constant 0 : index
    %c0_41 = arith.constant 0 : index
    %43 = vector.load %arg3[%c1_39, %c0_40, %c0_41] : memref<3x64x64xf32, #tpu.memory_space<vmem>>, vector<1x64x64xf32>
    %44 = vector.shape_cast %43 : vector<1x64x64xf32> to vector<64x64xf32>
    %cst_42 = arith.constant dense<0.000000e+00> : vector<32x64xf32>
    %45 = tpu.matmul %42, %44, %cst_42 {dimension_numbers = #tpu.dot_dimension_numbers<[1], [0], [0], [1], [0, 0, 1, 1], [], []>} : vector<32x64xf32>, vector<64x64xf32>, vector<32x64xf32> -> vector<32x64xf32>
    %46 = arith.addf %40, %45 : vector<32x64xf32>
    %47 = vector.extract_strided_slice %33 {offsets = [0, 9, 0], sizes = [2, 16, 64], strides = [1, 1, 1]} : vector<2x25x64xf32> to vector<2x16x64xf32>
    %48 = vector.shape_cast %47 : vector<2x16x64xf32> to vector<32x64xf32>
    %c2_43 = arith.constant 2 : index
    %c0_44 = arith.constant 0 : index
    %c0_45 = arith.constant 0 : index
    %49 = vector.load %arg3[%c2_43, %c0_44, %c0_45] : memref<3x64x64xf32, #tpu.memory_space<vmem>>, vector<1x64x64xf32>
    %50 = vector.shape_cast %49 : vector<1x64x64xf32> to vector<64x64xf32>
    %cst_46 = arith.constant dense<0.000000e+00> : vector<32x64xf32>
    %51 = tpu.matmul %48, %50, %cst_46 {dimension_numbers = #tpu.dot_dimension_numbers<[1], [0], [0], [1], [0, 0, 1, 1], [], []>} : vector<32x64xf32>, vector<64x64xf32>, vector<32x64xf32> -> vector<32x64xf32>
    %52 = arith.addf %46, %51 : vector<32x64xf32>
    %c0_47 = arith.constant 0 : index
    %c0_48 = arith.constant 0 : index
    %53 = vector.load %arg4[%c0_47, %c0_48] : memref<1x64xf32, #tpu.memory_space<vmem>>, vector<1x64xf32>
    %54 = vector.broadcast %53 : vector<1x64xf32> to vector<32x64xf32>
    %55 = arith.addf %52, %54 : vector<32x64xf32>
    %c0_49 = arith.constant 0 : index
    %c0_50 = arith.constant 0 : index
    %c0_51 = arith.constant 0 : index
    %56 = vector.load %arg0[%c0_49, %c0_50, %c0_51] : memref<2x16x64xf32, #tpu.memory_space<vmem>>, vector<2x16x64xf32>
    %57 = vector.shape_cast %56 : vector<2x16x64xf32> to vector<32x64xf32>
    %58 = arith.addf %55, %57 : vector<32x64xf32>
    %cst_52 = arith.constant dense<0.000000e+00> : vector<64xf32>
    %59 = vector.multi_reduction <add>, %58, %cst_52 [0] : vector<32x64xf32> to vector<64xf32>
    %60 = vector.shape_cast %59 : vector<64xf32> to vector<1x64xf32>
    %61 = vector.shape_cast %60 : vector<1x64xf32> to vector<1x64xf32>
    %62 = vector.broadcast %61 : vector<1x64xf32> to vector<8x64xf32>
    %63 = arith.mulf %58, %58 : vector<32x64xf32>
    %cst_53 = arith.constant dense<0.000000e+00> : vector<64xf32>
    %64 = vector.multi_reduction <add>, %63, %cst_53 [0] : vector<32x64xf32> to vector<64xf32>
    %65 = vector.shape_cast %64 : vector<64xf32> to vector<1x64xf32>
    %66 = vector.shape_cast %65 : vector<1x64xf32> to vector<1x64xf32>
    %67 = vector.broadcast %66 : vector<1x64xf32> to vector<8x64xf32>
    %c0_54 = arith.constant 0 : index
    %c0_55 = arith.constant 0 : index
    %68 = vector.load %arg5[%c0_54, %c0_55] : memref<64x4xf32, #tpu.memory_space<vmem>>, vector<64x4xf32>
    %cst_56 = arith.constant dense<0.000000e+00> : vector<8x4xf32>
    %69 = tpu.matmul %62, %68, %cst_56 {dimension_numbers = #tpu.dot_dimension_numbers<[1], [0], [0], [1], [0, 0, 1, 1], [], []>} : vector<8x64xf32>, vector<64x4xf32>, vector<8x4xf32> -> vector<8x4xf32>
    %c0_57 = arith.constant 0 : index
    %c0_58 = arith.constant 0 : index
    %70 = vector.load %arg5[%c0_57, %c0_58] : memref<64x4xf32, #tpu.memory_space<vmem>>, vector<64x4xf32>
    %cst_59 = arith.constant dense<0.000000e+00> : vector<8x4xf32>
    %71 = tpu.matmul %67, %70, %cst_59 {dimension_numbers = #tpu.dot_dimension_numbers<[1], [0], [0], [1], [0, 0, 1, 1], [], []>} : vector<8x64xf32>, vector<64x4xf32>, vector<8x4xf32> -> vector<8x4xf32>
    %cst_60 = arith.constant 0.001953125 : f32
    %72 = vector.broadcast %cst_60 : f32 to vector<8x4xf32>
    %73 = arith.mulf %69, %72 : vector<8x4xf32>
    %cst_61 = arith.constant 0.001953125 : f32
    %74 = vector.broadcast %cst_61 : f32 to vector<8x4xf32>
    %75 = arith.mulf %71, %74 : vector<8x4xf32>
    %76 = arith.mulf %73, %73 : vector<8x4xf32>
    %77 = arith.subf %75, %76 : vector<8x4xf32>
    %cst_62 = arith.constant 9.99999974E-6 : f32
    %78 = vector.broadcast %cst_62 : f32 to vector<8x4xf32>
    %79 = arith.addf %77, %78 : vector<8x4xf32>
    %80 = math.rsqrt %79 : vector<8x4xf32>
    %c0_63 = arith.constant 0 : index
    %c0_64 = arith.constant 0 : index
    %81 = vector.load %arg7[%c0_63, %c0_64] : memref<1x4xf32, #tpu.memory_space<vmem>>, vector<1x4xf32>
    %82 = vector.broadcast %81 : vector<1x4xf32> to vector<8x4xf32>
    %83 = arith.mulf %82, %80 : vector<8x4xf32>
    %c0_65 = arith.constant 0 : index
    %c0_66 = arith.constant 0 : index
    %84 = vector.load %arg8[%c0_65, %c0_66] : memref<1x4xf32, #tpu.memory_space<vmem>>, vector<1x4xf32>
    %85 = arith.mulf %73, %83 : vector<8x4xf32>
    %86 = vector.broadcast %84 : vector<1x4xf32> to vector<8x4xf32>
    %87 = arith.subf %86, %85 : vector<8x4xf32>
    %c0_67 = arith.constant 0 : index
    %c0_68 = arith.constant 0 : index
    %88 = vector.load %arg6[%c0_67, %c0_68] : memref<4x64xf32, #tpu.memory_space<vmem>>, vector<4x64xf32>
    %cst_69 = arith.constant dense<0.000000e+00> : vector<8x64xf32>
    %89 = tpu.matmul %83, %88, %cst_69 {dimension_numbers = #tpu.dot_dimension_numbers<[1], [0], [0], [1], [0, 0, 1, 1], [], []>} : vector<8x4xf32>, vector<4x64xf32>, vector<8x64xf32> -> vector<8x64xf32>
    %90 = vector.extract_strided_slice %89 {offsets = [0, 0], sizes = [1, 64], strides = [1, 1]} : vector<8x64xf32> to vector<1x64xf32>
    %c0_70 = arith.constant 0 : index
    %c0_71 = arith.constant 0 : index
    %91 = vector.load %arg6[%c0_70, %c0_71] : memref<4x64xf32, #tpu.memory_space<vmem>>, vector<4x64xf32>
    %cst_72 = arith.constant dense<0.000000e+00> : vector<8x64xf32>
    %92 = tpu.matmul %87, %91, %cst_72 {dimension_numbers = #tpu.dot_dimension_numbers<[1], [0], [0], [1], [0, 0, 1, 1], [], []>} : vector<8x4xf32>, vector<4x64xf32>, vector<8x64xf32> -> vector<8x64xf32>
    %93 = vector.extract_strided_slice %92 {offsets = [0, 0], sizes = [1, 64], strides = [1, 1]} : vector<8x64xf32> to vector<1x64xf32>
    %94 = vector.broadcast %90 : vector<1x64xf32> to vector<32x64xf32>
    %95 = arith.mulf %58, %94 : vector<32x64xf32>
    %96 = vector.broadcast %93 : vector<1x64xf32> to vector<32x64xf32>
    %97 = arith.addf %95, %96 : vector<32x64xf32>
    %cst_73 = arith.constant 0.000000e+00 : f32
    %98 = vector.broadcast %cst_73 : f32 to vector<32x64xf32>
    %99 = arith.maximumf %97, %98 : vector<32x64xf32>
    %c0_74 = arith.constant 0 : index
    %c0_75 = arith.constant 0 : index
    %100 = vector.load %arg9[%c0_74, %c0_75] : memref<32x64xf32, #tpu.memory_space<vmem>>, vector<32x64xf32>
    tpu.vector_store %arg9[%c0_74, %c0_75], %99 {strides = array<i32>} : memref<32x64xf32, #tpu.memory_space<vmem>>, vector<32x64xf32>,
    return
  }
}

</mosaic_0001>

<bundles_post_ra>
// kernel: tpu_custom_call.1
= control target key start
LH: loop header
LB: loop body
LE: loop exit
PB: predicated region body
PF: predicated region fallthrough
CT: control target
= control target key end

     0   :  { %14 = vsyncpa [#allocation5], 0  ;;  %s1877_s0 = inlined_call_operand.vmem [shape: f32[2,16,64], index: 0, kind: input, shape index: {}]   ;;  %s1878_s1 = inlined_call_operand.hbm [shape: f32[3,64,64], index: 1, kind: input, shape index: {}]   ;;  %s1879_s2 = inlined_call_operand.vmem [shape: f32[1,64], index: 2, kind: input, shape index: {}]   ;;  %s1880_s3 = inlined_call_operand.hbm [shape: f32[3,64,64], index: 3, kind: input, shape index: {}]   ;;  %s1881_s4 = inlined_call_operand.vmem [shape: f32[1,64], index: 4, kind: input, shape index: {}]   ;;  %s1882_s5 = inlined_call_operand.vmem [shape: f32[64,4], index: 5, kind: input, shape index: {}]   ;;  %s1883_s6 = inlined_call_operand.vmem [shape: f32[4,64], index: 6, kind: input, shape index: {}]   ;;  %s1884_s7 = inlined_call_operand.vmem [shape: f32[1,4], index: 7, kind: input, shape index: {}]   ;;  %s1885_s8 = inlined_call_operand.vmem [shape: f32[1,4], index: 8, kind: input, shape index: {}]   ;;  %s1886_s9 = inlined_call_operand.hbm [shape: f32[32,64], index: 9, kind: output, shape index: {}]  }
   0x1   :  { %15 = vsyncpa [#allocation8], 0 }
   0x2   :  { %16 = vsyncpa [#allocation6], 0  ;;  %s1601_s30 = smov [#allocation4]  }
   0x3   :  { %s24_s10 = sshll.u32 %s1601_s30, 4  ;;  %s25_s10 = int_to_ptr.vmem [resolvable:$true] %s24_s10 }
   0x4   :  { %s1543_s11 = scalar_lea.vmem %s25_s10, 3072  ;;  %p1548_p1 = scmp.lt.s32.totalorder %s25_s10, %s25_s10 }
   0x5   :  { %p1544_p0 = scmp.ne.s32.totalorder %s25_s10, %s1543_s11  ;;  %p1549_p2 = scmp.lt.s32.totalorder %s1543_s11, %s1543_s11 }
   0x7   :  { %p1550_p3 = por %p1549_p2, %p1548_p1 }
   0x9   :  { %p1551_p4 = pnand %p1550_p3, %p1544_p0 }
   0xb   :  { %1554 = shalt.err (!%p1551_p4)
}
   0xc   :  { %s1602_s12 = smov 128   ;;  %s1603_s13 = smov 8  }
   0xd   :  { %30 = dma.hbm_to_vmem [thread:$0]  %s1878_s1, 3072, %s25_s10, [#allocation5], %s1602_s12, %s1602_s12, %s1603_s13  }
   0xe   :  { %s1604_s16 = smov [#allocation7]  }
   0xf   :  { %s38_s17 = sshll.u32 %s1604_s16, 4  ;;  %s39_s17 = int_to_ptr.vmem [resolvable:$true] %s38_s17 }
  0x10   :  { %s1563_s18 = scalar_lea.vmem %s39_s17, 3072  ;;  %p1568_p6 = scmp.lt.s32.totalorder %s39_s17, %s39_s17 }
  0x11   :  { %p1564_p5 = scmp.ne.s32.totalorder %s39_s17, %s1563_s18  ;;  %p1569_p7 = scmp.lt.s32.totalorder %s1563_s18, %s1563_s18 }
  0x13   :  { %p1570_p8 = por %p1569_p7, %p1568_p6 }
  0x15   :  { %p1571_p9 = pnand %p1570_p8, %p1564_p5 }
  0x17   :  { %1574 = shalt.err (!%p1571_p9)
}
  0x18   :  { %44 = dma.hbm_to_vmem [thread:$0]  %s1880_s3, 3072, %s39_s17, [#allocation8], %s1602_s12, %s1602_s12, %s1603_s13  }
  0x19   :  { %1595 = dma.done.wait [#allocation5], 3072  }
  0x1a   :  { %1596 = vsyncadd [#allocation5], 4294964224 }
  0x1b   :  { %1597 = dma.done.wait [#allocation8], 3072  }
  0x1c   :  { %1598 = vsyncadd [#allocation8], 4294964224  ;;  %vm61_vm0 = vcmask 523264   ;;  %v1605_v0 = vmov 0.0   ;;  %vm65_vm1 = vcmask 516096   ;;  %v120_v1 = vld [vmem:[#allocation4 + $0x78] sm:$0xff] }
  0x1d   :  { %63 = vst.msk [vmem:[#allocation2 + $0x8] sm:$0xff] %vm61_vm0, %v1605_v0  ;;  %62 = vst.msk [vmem:[#allocation2] sm:$0xff] %vm61_vm0, %v1605_v0  ;;  %v111_v2 = vld [vmem:[#allocation4 + $0x38] sm:$0xff]  ;;  %v119_v3 = vld [vmem:[#allocation4 + $0x70] sm:$0xff]  ;;  %1346 = vmatprep.subr.mxu0 %v120_v1  ;;  %vm93_vm2 = vcmask 1040384   ;;  %vm309_vm3 = vcmask 1046528  }
  0x1e   :  { %64 = vst.msk [vmem:[#allocation2 + $0x10] sm:$0xff] %vm61_vm0, %v1605_v0  ;;  %67 = vst.msk [vmem:[#allocation2 + $0x20] sm:$0xff] %vm61_vm0, %v1605_v0  ;;  %1368 = vmatprep.subr.mxu1 %v111_v2  ;;  %v110_v4 = vld [vmem:[#allocation4 + $0x30] sm:$0xff]  ;;  %1347 = vmatpush3.msra.mxu0 %v120_v1  ;;  %v118_v5 = vld [vmem:[#allocation4 + $0x68] sm:$0xff]  ;;  %vm1606_vm4 = vmmov 0   ;;  %vm1029_vm5 = vcmask 1043456  }
  0x1f   :  { %68 = vst.msk [vmem:[#allocation2 + $0x28] sm:$0xff] %vm61_vm0, %v1605_v0  ;;  %69 = vst.msk [vmem:[#allocation2 + $0x30] sm:$0xff] %vm61_vm0, %v1605_v0  ;;  %1369 = vmatpush3.msra.mxu1 %v111_v2  ;;  %v109_v6 = vld [vmem:[#allocation4 + $0x28] sm:$0xff]  ;;  %1348 = vmatprep.subr.mxu0 %v119_v3  ;;  %v117_v7 = vld [vmem:[#allocation4 + $0x60] sm:$0xff]  ;;  %vm1025_vm6 = vcmask 31744  }
  0x20   :  { %441 = vst.msk [vmem:[#allocation3] sm:$0xff] %vm61_vm0, %v1605_v0  ;;  %442 = vst.msk [vmem:[#allocation3 + $0x8] sm:$0xff] %vm61_vm0, %v1605_v0  ;;  %1370 = vmatprep.subr.mxu1 %v110_v4  ;;  %1349 = vmatpush3.msra.mxu0 %v119_v3  ;;  %v108_v8 = vld [vmem:[#allocation4 + $0x20] sm:$0xff]  ;;  %v116_v10 = vld [vmem:[#allocation4 + $0x58] sm:$0xff] }
  0x21   :  { %443 = vst.msk [vmem:[#allocation3 + $0x10] sm:$0xff] %vm61_vm0, %v1605_v0  ;;  %445 = vst.msk [vmem:[#allocation3 + $0x20] sm:$0xff] %vm61_vm0, %v1605_v0  ;;  %1371 = vmatpush3.msra.mxu1 %v110_v4  ;;  %1350 = vmatprep.subr.mxu0 %v118_v5  ;;  %v1701_v9 = vld [vmem:[%s1877_s0] sm:$0xff]  ;;  %v107_v11 = vld [vmem:[#allocation4 + $0x18] sm:$0xff] }
  0x22   :  { %446 = vst.msk [vmem:[#allocation3 + $0x28] sm:$0xff] %vm61_vm0, %v1605_v0  ;;  %447 = vst.msk [vmem:[#allocation3 + $0x30] sm:$0xff] %vm61_vm0, %v1605_v0  ;;  %1372 = vmatprep.subr.mxu1 %v109_v6  ;;  %1351 = vmatpush3.msra.mxu0 %v118_v5  ;;  %v1708_v12 = vld [vmem:[%s1877_s0 + $0x8] sm:$0xff]  ;;  %v115_v13 = vld [vmem:[#allocation4 + $0x50] sm:$0xff] }
  0x23   :  { %66 = vst.msk [vmem:[#allocation2 + $0x18] sm:$0x1] %vm65_vm1, %v1605_v0  ;;  %70 = vst.msk [vmem:[#allocation2 + $0x38] sm:$0x1] %vm65_vm1, %v1605_v0  ;;  %1373 = vmatpush3.msra.mxu1 %v109_v6  ;;  %1352 = vmatprep.subr.mxu0 %v117_v7  ;;  %v106_v14 = vld [vmem:[#allocation4 + $0x10] sm:$0xff]  ;;  %v1720_v16 = vld [vmem:[%s1877_s0 + $0x18] sm:$0xff] }
  0x24   :  { %444 = vst.msk [vmem:[#allocation3 + $0x18] sm:$0x1] %vm65_vm1, %v1605_v0  ;;  %448 = vst.msk [vmem:[#allocation3 + $0x38] sm:$0x1] %vm65_vm1, %v1605_v0  ;;  %1374 = vmatprep.subr.mxu1 %v108_v8  ;;  %1353 = vmatpush3.msra.mxu0 %v117_v7  ;;  %v1715_v15 = vld [vmem:[%s1877_s0 + $0x10] sm:$0xff]  ;;  %v79_v17 = vld [vmem:[#allocation2] sm:$0xff] }
  0x25   :  { %75 = vst.msk [vmem:[#allocation2 + $0x8] sm:$0xff] %vm61_vm0, %v1701_v9  ;;  %76 = vst.msk [vmem:[#allocation2 + $0x10] sm:$0xff] %vm61_vm0, %v1708_v12  ;;  %1375 = vmatpush3.msra.mxu1 %v108_v8  ;;  %1354 = vmatprep.subr.mxu0 %v116_v10  ;;  %v114_v18 = vld [vmem:[#allocation4 + $0x48] sm:$0xff]  ;;  %v113_v20 = vld [vmem:[#allocation4 + $0x40] sm:$0xff]  ;;  %v94_v22 = vrot.slane %v79_v17, 7 }
  0x26   :  { %1376 = vmatprep.subr.mxu1 %v107_v11  ;;  %77 = vst.msk [vmem:[#allocation2 + $0x28] sm:$0xff] %vm61_vm0, %v1715_v15  ;;  %78 = vst.msk [vmem:[#allocation2 + $0x30] sm:$0xff] %vm61_vm0, %v1720_v16  ;;  %1355 = vmatpush3.msra.mxu0 %v116_v10  ;;  %v105_v19 = vld [vmem:[#allocation4 + $0x8] sm:$0xff]  ;;  %v104_v21 = vld [vmem:[#allocation4] sm:$0xff] }
  0x27   :  { %1377 = vmatpush3.msra.mxu1 %v107_v11  ;;  %1356 = vmatprep.subr.mxu0 %v115_v13  ;;  %v83_v23 = vld [vmem:[#allocation2 + $0x20] sm:$0xff]  ;;  %v328_v31 = vld [vmem:[#allocation4 + $0xb8] sm:$0xff]  ;;  %v327_v38 = vld [vmem:[#allocation4 + $0xb0] sm:$0xff] }
  0x28   :  { %1378 = vmatprep.subr.mxu1 %v106_v14  ;;  %1357 = vmatpush3.msra.mxu0 %v115_v13  ;;  %v99_v28 = vrot.slane %v83_v23, 7  ;;  %v326_v41 = vld [vmem:[#allocation4 + $0xa8] sm:$0xff]  ;;  %v325_v43 = vld [vmem:[#allocation4 + $0xa0] sm:$0xff]  ;;  %v324_v44 = vld [vmem:[#allocation4 + $0x98] sm:$0xff] }
  0x29   :  { %1379 = vmatpush3.msra.mxu1 %v106_v14  ;;  %1358 = vmatprep.subr.mxu0 %v114_v18  ;;  %v323_v46 = vld [vmem:[#allocation4 + $0x90] sm:$0xff]  ;;  %v322_v47 = vld [vmem:[#allocation4 + $0x88] sm:$0xff]  ;;  %v321_v52 = vld [vmem:[#allocation4 + $0x80] sm:$0xff] }
  0x2a   :  { %1380 = vmatprep.subr.mxu1 %v105_v19  ;;  %1359 = vmatpush3.msra.mxu0 %v114_v18  ;;  %v82_v45 = vld [vmem:[#allocation2 + $0x18] sm:$0x1]  ;;  %v492_v58 = vld [vmem:[#allocation7 + $0x70] sm:$0xff]  ;;  %v491_v59 = vld [vmem:[#allocation7 + $0x68] sm:$0xff] }
  0x2b   :  { %1381 = vmatpush3.msra.mxu1 %v105_v19  ;;  %1360 = vmatprep.subr.mxu0 %v113_v20  ;;  %v313_v48 = vrot.slane %v82_v45, 1  ;;  %v86_v51 = vld [vmem:[#allocation2 + $0x38] sm:$0x1]  ;;  %v490_v61 = vld [vmem:[#allocation7 + $0x60] sm:$0xff]  ;;  %v483_v62 = vld [vmem:[#allocation7 + $0x30] sm:$0xff] }
  0x2c   :  { %v80_v24 = vld [vmem:[#allocation2 + $0x8] sm:$0xff]  ;;  %v81_v26 = vld [vmem:[#allocation2 + $0x10] sm:$0xff]  ;;  %1382 = vmatprep.subr.mxu1 %v104_v21  ;;  %1361 = vmatpush3.msra.mxu0 %v113_v20  ;;  %v318_v54 = vrot.slane %v86_v51, 1  ;;  %v493_v57 = vld [vmem:[#allocation7 + $0x78] sm:$0xff] }
  0x2d   :  { %v95_v25 = vrot.slane %v80_v24, 7  ;;  %v97_v27 = vrot.slane %v81_v26, 7  ;;  %1362 = vmatprep.mubr.msk.f32.mxu0 %vm61_vm0, %v80_v24  ;;  %v310_v29 = vrot.slane %v80_v24, 1  ;;  %v84_v32 = vld [vmem:[#allocation2 + $0x28] sm:$0xff]  ;;  %v85_v33 = vld [vmem:[#allocation2 + $0x30] sm:$0xff]  ;;  %1383 = vmatpush3.msra.mxu1 %v104_v21  ;;  %v311_v34 = vrot.slane %v81_v26, 1 }
  0x2e   :  { %v100_v36 = vrot.slane %v84_v32, 7  ;;  %v102_v37 = vrot.slane %v85_v33, 7  ;;  %1363 = vmatmul.mubr.msk.f32.vlgmr.msra.gmra.mxu0 %vm61_vm0, %v81_v26  ;;  %1390 = vmatprep.subr.mxu0 %v328_v31  ;;  %v315_v49 = vrot.slane %v84_v32, 1  ;;  %v316_v50 = vrot.slane %v85_v33, 1  ;;  %v484_v60 = vld [vmem:[#allocation7 + $0x38] sm:$0xff]  ;;  %v482_v1 = vld [vmem:[#allocation7 + $0x28] sm:$0xff] }
  0x2f   :  { %v96_v30 = vsel %vm93_vm2, %v94_v22, %v95_v25  ;;  %v98_v35 = vsel %vm93_vm2, %v95_v25, %v97_v27  ;;  %1365 = vmatprep.mubr.msk.f32.mxu0 %vm61_vm0, %v84_v32  ;;  %1391 = vmatpush3.msra.mxu0 %v328_v31  ;;  %v312_v42 = vsel %vm309_vm3, %v310_v29, %v311_v34  ;;  %v489_v63 = vld [vmem:[#allocation7 + $0x58] sm:$0xff]  ;;  %v488_v2 = vld [vmem:[#allocation7 + $0x50] sm:$0xff]  ;;  %v481_v3 = vld [vmem:[#allocation7 + $0x20] sm:$0xff] }
  0x30   :  { %1384 = vmatprep.mubr.msk.f32.mxu1 %vm61_vm0, %v96_v30  ;;  %v101_v39 = vsel %vm93_vm2, %v99_v28, %v100_v36  ;;  %v103_v40 = vsel %vm93_vm2, %v100_v36, %v102_v37  ;;  %1392 = vmatprep.subr.mxu0 %v327_v38  ;;  %v314_v53 = vsel %vm309_vm3, %v311_v34, %v313_v48  ;;  %v487_v4 = vld [vmem:[#allocation7 + $0x48] sm:$0xff]  ;;  %v480_v5 = vld [vmem:[#allocation7 + $0x18] sm:$0xff]  ;;  %v486_v6 = vld [vmem:[#allocation7 + $0x40] sm:$0xff] }
  0x31   :  { %1385 = vmatmul.mubr.msk.f32.vlgmr.msra.gmra.mxu1 %vm61_vm0, %v98_v35  ;;  %1393 = vmatpush3.msra.mxu0 %v327_v38  ;;  %v317_v55 = vsel %vm309_vm3, %v315_v49, %v316_v50  ;;  %v319_v56 = vsel %vm309_vm3, %v316_v50, %v318_v54  ;;  %v479_v7 = vld [vmem:[#allocation7 + $0x10] sm:$0xff]  ;;  %v478_v8 = vld [vmem:[#allocation7 + $0x8] sm:$0xff]  ;;  %v700_v10 = vld [vmem:[#allocation7 + $0xb8] sm:$0xff] }
  0x32   :  { %1387 = vmatprep.mubr.msk.f32.mxu1 %vm61_vm0, %v101_v39  ;;  %1394 = vmatprep.subr.mxu0 %v326_v41  ;;  %v477_v11 = vld [vmem:[#allocation7] sm:$0xff]  ;;  %v699_v51 = vld [vmem:[#allocation7 + $0xb0] sm:$0xff] }
  0x33   :  { %1366 = vmatmul.mubr.msk.f32.gmra.mxu0 %vm61_vm0, %v85_v33  ;;  %1412 = vmatprep.subr.mxu1 %v493_v57  ;;  %v1230_v24 = vld [vmem:[%s1879_s2] ss:$0 sm:$0xff] }
  0x34   :  { %1395 = vmatpush3.msra.mxu0 %v326_v41  ;;  %1406 = vmatprep.mubr.msk.f32.mxu0 %vm61_vm0, %v312_v42  ;;  %v457_v48 = vld [vmem:[#allocation3 + $0x20] sm:$0xff] }
  0x35   :  { %1388 = vmatmul.mubr.msk.f32.gmra.mxu1 %vm61_vm0, %v103_v40  ;;  %1396 = vmatprep.subr.mxu0 %v325_v43 }
  0x36   :  { %1397 = vmatpush3.msra.mxu0 %v325_v43  ;;  %1413 = vmatpush3.msra.mxu1 %v493_v57  ;;  %v472_v57 = vrot.slane %v457_v48, 7 }
  0x37   :  { %1398 = vmatprep.subr.mxu0 %v324_v44  ;;  %1414 = vmatprep.subr.mxu1 %v492_v58 }
  0x38   :  { %1399 = vmatpush3.msra.mxu0 %v324_v44  ;;  %1415 = vmatpush3.msra.mxu1 %v492_v58  ;;  %v453_v44 = vld [vmem:[#allocation3] sm:$0xff] }
  0x39   :  { %1400 = vmatprep.subr.mxu0 %v323_v46  ;;  %1416 = vmatprep.subr.mxu1 %v491_v59 }
  0x3a   :  { %1401 = vmatpush3.msra.mxu0 %v323_v46  ;;  %1417 = vmatpush3.msra.mxu1 %v491_v59  ;;  %v467_v46 = vrot.slane %v453_v44, 7 }
  0x3b   :  { %1402 = vmatprep.subr.mxu0 %v322_v47  ;;  %1418 = vmatprep.subr.mxu1 %v490_v61 }
  0x3c   :  { %1403 = vmatpush3.msra.mxu0 %v322_v47  ;;  %1419 = vmatpush3.msra.mxu1 %v490_v61 }
  0x3d   :  { %1404 = vmatprep.subr.mxu0 %v321_v52  ;;  %1420 = vmatprep.subr.mxu1 %v489_v63 }
  0x3e   :  { %1405 = vmatpush3.msra.mxu0 %v321_v52  ;;  %1421 = vmatpush3.msra.mxu1 %v489_v63 }
  0x3f   :  { %1407 = vmatmul.mubr.msk.f32.vlgmr.msra.gmra.mxu0 %vm61_vm0, %v314_v53  ;;  %1434 = vmatprep.subr.mxu0 %v484_v60 }
  0x40   :  { %1409 = vmatprep.mubr.msk.f32.mxu0 %vm61_vm0, %v317_v55  ;;  %1435 = vmatpush3.msra.mxu0 %v484_v60 }
  0x41   :  { %1436 = vmatprep.subr.mxu0 %v483_v62  ;;  %1422 = vmatprep.subr.mxu1 %v488_v2 }
  0x42   :  { %1437 = vmatpush3.msra.mxu0 %v483_v62  ;;  %1423 = vmatpush3.msra.mxu1 %v488_v2  ;;  %v697_v62 = vld [vmem:[#allocation7 + $0xa0] sm:$0xff] }
  0x43   :  { %1410 = vmatmul.mubr.msk.f32.gmra.mxu0 %vm61_vm0, %v319_v56  ;;  %1438 = vmatprep.subr.mxu0 %v482_v1  ;;  %v698_v56 = vld [vmem:[#allocation7 + $0xa8] sm:$0xff] }
  0x44   :  { %1439 = vmatpush3.msra.mxu0 %v482_v1  ;;  %1424 = vmatprep.subr.mxu1 %v487_v4 }
  0x45   :  { %1440 = vmatprep.subr.mxu0 %v481_v3  ;;  %1425 = vmatpush3.msra.mxu1 %v487_v4  ;;  %v695_v4 = vld [vmem:[#allocation7 + $0x90] sm:$0xff] }
  0x46   :  { %1441 = vmatpush3.msra.mxu0 %v481_v3  ;;  %1426 = vmatprep.subr.mxu1 %v486_v6  ;;  %v696_v3 = vld [vmem:[#allocation7 + $0x98] sm:$0xff] }
  0x47   :  { %1442 = vmatprep.subr.mxu0 %v480_v5  ;;  %1427 = vmatpush3.msra.mxu1 %v486_v6  ;;  %v694_v6 = vld [vmem:[#allocation7 + $0x88] sm:$0xff] }
  0x48   :  { %1443 = vmatpush3.msra.mxu0 %v480_v5  ;;  %1456 = vmatprep.subr.mxu1 %v700_v10  ;;  %v456_v5 = vld [vmem:[#allocation3 + $0x18] sm:$0x1] }
  0x49   :  { %1444 = vmatprep.subr.mxu0 %v479_v7 }
  0x4a   :  { %1445 = vmatpush3.msra.mxu0 %v479_v7  ;;  %v693_v7 = vld [vmem:[#allocation7 + $0x80] sm:$0xff] }
  0x4b   :  { %1446 = vmatprep.subr.mxu0 %v478_v8 }
  0x4c   :  { %1447 = vmatpush3.msra.mxu0 %v478_v8  ;;  %v685_v8 = vrot.slane %v456_v5, 1 }
  0x4d   :  { %1448 = vmatprep.subr.mxu0 %v477_v11 }
  0x4e   :  { %1449 = vmatpush3.msra.mxu0 %v477_v11  ;;  %v460_v11 = vld [vmem:[#allocation3 + $0x38] sm:$0x1] }
  0x4f   :  { %1478 = vmatprep.subr.mxu0 %v1605_v0 }
  0xee   :  { %v1364_v13 = vpop.f32.mrf.mxu0 }
  0xf0   :  { %v195_v17 = vpop.f32.mrf.mxu0 }
  0xf1   :  { %v1386_v14 = vpop.f32.mrf.mxu1 }
  0xf2   :  { %v294_v22 = vadd.f32 %v1386_v14, %v1364_v13 }
  0xf3   :  { %v1367_v18 = vpop.f32.mrf.mxu0  ;;  %v288_v19 = vpop.f32.mrf.mxu1 }
  0xf4   :  { %v289_v25 = vadd.f32 %v288_v19, %v195_v17  ;;  %v690_v17 = vrot.slane %v460_v11, 1 }
  0xf5   :  { %v1389_v20 = vpop.f32.mrf.mxu1  ;;  %v205_v21 = vpop.f32.mrf.mxu0 }
  0xf6   :  { %v304_v29 = vadd.f32 %v1389_v20, %v1367_v18  ;;  %v854_v20 = vld [vmem:[%s1882_s5 + $0x38] sm:$0xff] }
  0xf7   :  { %v298_v27 = vpop.f32.mrf.mxu1 }
  0xf8   :  { %v299_v33 = vadd.f32 %v298_v27, %v205_v21  ;;  %v853_v21 = vld [vmem:[%s1882_s5 + $0x30] sm:$0xff]  ;;  %v847_v27 = vld [vmem:[%s1882_s5] sm:$0xff] }
  0xff   :  { %v1408_v23 = vpop.f32.mrf.mxu0 }
 0x100   :  { %v423_v26 = vadd.f32 %v1408_v23, %v294_v22  ;;  %v852_v22 = vld [vmem:[%s1882_s5 + $0x28] sm:$0xff]  ;;  %v851_v23 = vld [vmem:[%s1882_s5 + $0x20] sm:$0xff] }
 0x101   :  { %v403_v28 = vpop.f32.mrf.mxu0 }
 0x102   :  { %v434_v30 = vadd.f32 %v1230_v24, %v423_v26  ;;  %v422_v31 = vadd.f32 %v403_v28, %v289_v25  ;;  %v849_v25 = vld [vmem:[%s1882_s5 + $0x10] sm:$0xff]  ;;  %v848_v26 = vld [vmem:[%s1882_s5 + $0x8] sm:$0xff] }
 0x103   :  { %v1411_v32 = vpop.f32.mrf.mxu0 }
 0x104   :  { %v438_v34 = vmax.f32 %v434_v30, 0.0  ;;  %v433_v35 = vadd.f32 %v1230_v24, %v422_v31  ;;  %v425_v36 = vadd.f32 %v1411_v32, %v304_v29 }
 0x105   :  { %v413_v37 = vpop.f32.mrf.mxu0 }
 0x106   :  { %450 = vst.msk [vmem:[#allocation3 + $0x10] sm:$0xff] %vm61_vm0, %v438_v34  ;;  %v437_v38 = vmax.f32 %v433_v35, 0.0  ;;  %v436_v39 = vadd.f32 %v1230_v24, %v425_v36  ;;  %v424_v40 = vadd.f32 %v413_v37, %v299_v33  ;;  %v1243_v37 = vld [vmem:[%s1881_s4] ss:$0 sm:$0xff] }
 0x108   :  { %449 = vst.msk [vmem:[#allocation3 + $0x8] sm:$0xff] %vm61_vm0, %v437_v38  ;;  %v440_v41 = vmax.f32 %v436_v39, 0.0  ;;  %v435_v42 = vadd.f32 %v1230_v24, %v424_v40  ;;  %v850_v24 = vld [vmem:[%s1882_s5 + $0x18] sm:$0xff] }
 0x10a   :  { %452 = vst.msk [vmem:[#allocation3 + $0x30] sm:$0xff] %vm61_vm0, %v440_v41  ;;  %v439_v43 = vmax.f32 %v435_v42, 0.0 }
 0x10c   :  { %451 = vst.msk [vmem:[#allocation3 + $0x28] sm:$0xff] %vm61_vm0, %v439_v43 }
 0x10d   :  { %v455_v45 = vld [vmem:[#allocation3 + $0x10] sm:$0xff] }
 0x10e   :  { %v470_v50 = vrot.slane %v455_v45, 7  ;;  %v683_v61 = vrot.slane %v455_v45, 1 }
 0x10f   :  { %v454_v47 = vld [vmem:[#allocation3 + $0x8] sm:$0xff] }
 0x110   :  { %v468_v49 = vrot.slane %v454_v47, 7  ;;  %1428 = vmatprep.mubr.msk.f32.mxu1 %vm61_vm0, %v454_v47  ;;  %v682_v53 = vrot.slane %v454_v47, 1  ;;  %v686_v14 = vsel %vm309_vm3, %v683_v61, %v685_v8 }
 0x111   :  { %1429 = vmatmul.mubr.msk.f32.vlgmr.msra.gmra.mxu1 %vm61_vm0, %v455_v45  ;;  %v459_v52 = vld [vmem:[#allocation3 + $0x30] sm:$0xff] }
 0x112   :  { %1457 = vmatpush3.msra.mxu1 %v700_v10  ;;  %v469_v54 = vsel %vm93_vm2, %v467_v46, %v468_v49  ;;  %v471_v55 = vsel %vm93_vm2, %v468_v49, %v470_v50  ;;  %v475_v60 = vrot.slane %v459_v52, 7  ;;  %v684_v63 = vsel %vm309_vm3, %v682_v53, %v683_v61 }
 0x113   :  { %1458 = vmatprep.subr.mxu1 %v699_v51  ;;  %1450 = vmatprep.mubr.msk.f32.mxu0 %vm61_vm0, %v469_v54  ;;  %v458_v58 = vld [vmem:[#allocation3 + $0x28] sm:$0xff]  ;;  %v688_v13 = vrot.slane %v459_v52, 1 }
 0x114   :  { %1459 = vmatpush3.msra.mxu1 %v699_v51  ;;  %v473_v59 = vrot.slane %v458_v58, 7  ;;  %1431 = vmatprep.mubr.msk.f32.mxu1 %vm61_vm0, %v458_v58  ;;  %v687_v10 = vrot.slane %v458_v58, 1 }
 0x115   :  { %1451 = vmatmul.mubr.msk.f32.vlgmr.msra.gmra.mxu0 %vm61_vm0, %v471_v55  ;;  %1460 = vmatprep.subr.mxu1 %v698_v56  ;;  %v691_v19 = vsel %vm309_vm3, %v688_v13, %v690_v17 }
 0x116   :  { %1432 = vmatmul.mubr.msk.f32.gmra.mxu1 %vm61_vm0, %v459_v52  ;;  %v474_v1 = vsel %vm93_vm2, %v472_v57, %v473_v59  ;;  %v476_v2 = vsel %vm93_vm2, %v473_v59, %v475_v60  ;;  %v689_v18 = vsel %vm309_vm3, %v687_v10, %v688_v13  ;;  %1479 = vmatpush3.msra.mxu0 %v854_v20 }
 0x117   :  { %1461 = vmatpush3.msra.mxu1 %v698_v56  ;;  %1472 = vmatprep.mubr.msk.f32.mxu1 %vm61_vm0, %v684_v63 }
 0x118   :  { %1462 = vmatprep.subr.mxu1 %v697_v62  ;;  %1453 = vmatprep.mubr.msk.f32.mxu0 %vm61_vm0, %v474_v1 }
 0x119   :  { %1463 = vmatpush3.msra.mxu1 %v697_v62  ;;  %1454 = vmatmul.mubr.msk.f32.gmra.mxu0 %vm61_vm0, %v476_v2 }
 0x11a   :  { %1464 = vmatprep.subr.mxu1 %v696_v3  ;;  %1480 = vmatprep.subr.mxu0 %v1605_v0 }
 0x11b   :  { %1465 = vmatpush3.msra.mxu1 %v696_v3  ;;  %1481 = vmatpush3.msra.mxu0 %v853_v21 }
 0x11c   :  { %1466 = vmatprep.subr.mxu1 %v695_v4  ;;  %1482 = vmatprep.subr.mxu0 %v1605_v0 }
 0x11d   :  { %1467 = vmatpush3.msra.mxu1 %v695_v4  ;;  %1483 = vmatpush3.msra.mxu0 %v852_v22 }
 0x11e   :  { %1468 = vmatprep.subr.mxu1 %v694_v6  ;;  %1484 = vmatprep.subr.mxu0 %v1605_v0 }
 0x11f   :  { %1469 = vmatpush3.msra.mxu1 %v694_v6  ;;  %1485 = vmatpush3.msra.mxu0 %v851_v23 }
 0x120   :  { %1470 = vmatprep.subr.mxu1 %v693_v7  ;;  %1486 = vmatprep.subr.mxu0 %v1605_v0 }
 0x121   :  { %1471 = vmatpush3.msra.mxu1 %v693_v7  ;;  %1487 = vmatpush3.msra.mxu0 %v850_v24 }
 0x122   :  { %1473 = vmatmul.mubr.msk.f32.vlgmr.msra.gmra.mxu1 %vm61_vm0, %v686_v14  ;;  %1497 = vmatprep.subr.mxu1 %v1605_v0 }
 0x123   :  { %1475 = vmatprep.mubr.msk.f32.mxu1 %vm61_vm0, %v689_v18  ;;  %1498 = vmatpush3.msra.mxu1 %v854_v20 }
 0x124   :  { %1499 = vmatprep.subr.mxu1 %v1605_v0  ;;  %1488 = vmatprep.subr.mxu0 %v1605_v0 }
 0x125   :  { %1500 = vmatpush3.msra.mxu1 %v853_v21  ;;  %1489 = vmatpush3.msra.mxu0 %v849_v25 }
 0x126   :  { %1476 = vmatmul.mubr.msk.f32.gmra.mxu1 %vm61_vm0, %v691_v19  ;;  %1501 = vmatprep.subr.mxu1 %v1605_v0 }
 0x127   :  { %1502 = vmatpush3.msra.mxu1 %v852_v22  ;;  %1490 = vmatprep.subr.mxu0 %v1605_v0 }
 0x128   :  { %1503 = vmatprep.subr.mxu1 %v1605_v0  ;;  %1491 = vmatpush3.msra.mxu0 %v848_v26 }
 0x129   :  { %1504 = vmatpush3.msra.mxu1 %v851_v23  ;;  %1494 = vmatprep.mubr.msk.f32.mxu0 %vm1606_vm4, %v1605_v0 }
 0x12a   :  { %1505 = vmatprep.subr.mxu1 %v1605_v0  ;;  %1492 = vmatprep.subr.mxu0 %v1605_v0 }
 0x12b   :  { %1506 = vmatpush3.msra.mxu1 %v850_v24  ;;  %1493 = vmatpush3.msra.mxu0 %v847_v27  ;;  %v1024_v24 = vld [vmem:[%s1883_s6] sm:$0xf] }
 0x12c   :  { %1507 = vmatprep.subr.mxu1 %v1605_v0  ;;  %1513 = vmatprep.mubr.msk.f32.mxu1 %vm1606_vm4, %v1605_v0 }
 0x12d   :  { %1508 = vmatpush3.msra.mxu1 %v849_v25  ;;  %1516 = vmatprep.subr.mxu0 %v1605_v0 }
 0x12e   :  { %1509 = vmatprep.subr.mxu1 %v1605_v0 }
 0x12f   :  { %1510 = vmatpush3.msra.mxu1 %v848_v26 }
 0x130   :  { %1511 = vmatprep.subr.mxu1 %v1605_v0 }
 0x131   :  { %1512 = vmatpush3.msra.mxu1 %v847_v27 }
 0x132   :  { %1521 = vmatprep.subr.mxu1 %v1605_v0 }
 0x1d1   :  { %v1430_v28 = vpop.f32.mrf.mxu1 }
 0x1d3   :  { %v568_v29 = vpop.f32.mrf.mxu1 }
 0x1d5   :  { %v1452_v30 = vpop.f32.mrf.mxu0 }
 0x1d6   :  { %v1433_v31 = vpop.f32.mrf.mxu1  ;;  %v667_v34 = vadd.f32 %v1452_v30, %v1430_v28 }
 0x1d7   :  { %v661_v32 = vpop.f32.mrf.mxu0 }
 0x1d8   :  { %v578_v33 = vpop.f32.mrf.mxu1  ;;  %v662_v38 = vadd.f32 %v661_v32, %v568_v29 }
 0x1d9   :  { %v1455_v35 = vpop.f32.mrf.mxu0 }
 0x1da   :  { %v677_v41 = vadd.f32 %v1455_v35, %v1433_v31 }
 0x1db   :  { %v671_v42 = vpop.f32.mrf.mxu0 }
 0x1dc   :  { %v672_v48 = vadd.f32 %v671_v42, %v578_v33 }
 0x1e2   :  { %v1474_v36 = vpop.f32.mrf.mxu1 }
 0x1e3   :  { %v795_v39 = vadd.f32 %v1474_v36, %v667_v34  ;;  %v1247_v36 = vld [vmem:[%s1885_s8] ss:$0 sm:$0xff] }
 0x1e4   :  { %v775_v40 = vpop.f32.mrf.mxu1 }
 0x1e5   :  { %v806_v43 = vadd.f32 %v1243_v37, %v795_v39  ;;  %v794_v44 = vadd.f32 %v775_v40, %v662_v38  ;;  %v1176_v39 = vlaneseq }
 0x1e6   :  { %v1477_v45 = vpop.f32.mrf.mxu1 }
 0x1e7   :  { %v805_v46 = vadd.f32 %v1243_v37, %v794_v44  ;;  %v797_v47 = vadd.f32 %v1477_v45, %v677_v41  ;;  %v1823_v49 = vadd.f32 %v806_v43, %v1708_v12  ;;  %v1177_v40 = vshrl.u32 %v1176_v39, 7 }
 0x1e8   :  { %v785_v50 = vpop.f32.mrf.mxu1 }
 0x1e9   :  { %v1826_v51 = vadd.f32 %v805_v46, %v1701_v9  ;;  %v808_v52 = vadd.f32 %v1243_v37, %v797_v47  ;;  %v796_v53 = vadd.f32 %v785_v50, %v672_v48  ;;  %v831_v55 = vmul.f32 %v1823_v49, %v1823_v49 }
 0x1ea   :  { %v818_v58 = vsel %vm61_vm0, %v1823_v49, 0.0  ;;  %v1178_v41 = vsub.s32 0, %v1177_v40 }
 0x1eb   :  { %v830_v54 = vmul.f32 %v1826_v51, %v1826_v51  ;;  %v817_v56 = vsel %vm61_vm0, %v1826_v51, 0.0  ;;  %v1835_v57 = vadd.f32 %v808_v52, %v1720_v16  ;;  %v807_v12 = vadd.f32 %v1243_v37, %v796_v53 }
 0x1ec   :  { %v819_v60 = vadd.f32 %v818_v58, %v817_v56  ;;  %v835_v61 = vsel %vm61_vm0, %v831_v55, 0.0 }
 0x1ed   :  { %v834_v9 = vsel %vm61_vm0, %v830_v54, 0.0  ;;  %v815_v59 = vadd.f32 %v807_v12, %v1715_v15  ;;  %v833_v62 = vmul.f32 %v1835_v57, %v1835_v57  ;;  %v822_v3 = vsel %vm61_vm0, %v1835_v57, 0.0 }
 0x1ee   :  { %v836_v2 = vadd.f32 %v835_v61, %v834_v9 }
 0x1ef   :  { %v820_v63 = vsel %vm61_vm0, %v815_v59, 0.0  ;;  %v832_v1 = vmul.f32 %v815_v59, %v815_v59  ;;  %v839_v15 = vsel %vm61_vm0, %v833_v62, 0.0 }
 0x1f0   :  { %v821_v16 = vadd.f32 %v820_v63, %v819_v60 }
 0x1f1   :  { %v837_v4 = vsel %vm61_vm0, %v832_v1, 0.0 }
 0x1f2   :  { %v823_v5 = vadd.f32 %v822_v3, %v821_v16  ;;  %v838_v6 = vadd.f32 %v837_v4, %v836_v2 }
 0x1f4   :  { %v824_v7 = vrot.slane %v823_v5, 4  ;;  %v840_v8 = vadd.f32 %v839_v15, %v838_v6 }
 0x1f6   :  { %v825_v10 = vadd.f32 %v824_v7, %v823_v5  ;;  %v841_v11 = vrot.slane %v840_v8, 4 }
 0x1f8   :  { %v826_v13 = vrot.slane %v825_v10, 2  ;;  %v842_v14 = vadd.f32 %v841_v11, %v840_v8 }
 0x1fa   :  { %v827_v17 = vadd.f32 %v826_v13, %v825_v10  ;;  %v843_v18 = vrot.slane %v842_v14, 2 }
 0x1fc   :  { %v828_v19 = vrot.slane %v827_v17, 1  ;;  %v844_v20 = vadd.f32 %v843_v18, %v842_v14 }
 0x1fe   :  { %v829_v21 = vadd.f32 %v828_v19, %v827_v17  ;;  %v845_v22 = vrot.slane %v844_v20, 1 }
 0x200   :  { %1495 = vmatmul.mubr.msk.f32.vlgmr.msra.gmra.mxu0 %vm61_vm0, %v829_v21  ;;  %v846_v23 = vadd.f32 %v845_v22, %v844_v20 }
 0x201   :  { %1518 = vmatprep.mubr.msk.f32.mxu0 %vm1606_vm4, %v1605_v0  ;;  %1517 = vmatpush3.msk.msra.mxu0 %vm1029_vm5, %v1024_v24 }
 0x202   :  { %1514 = vmatmul.mubr.msk.f32.vlgmr.msra.gmra.mxu1 %vm61_vm0, %v846_v23 }
 0x203   :  { %1523 = vmatprep.mubr.msk.f32.mxu1 %vm1606_vm4, %v1605_v0  ;;  %1522 = vmatpush3.msk.msra.mxu1 %vm1029_vm5, %v1024_v24  ;;  %v1246_v0 = vld [vmem:[%s1884_s7] ss:$0 sm:$0xff]  ;;  %s1607_s7 = smov [#allocation9]  }
 0x204   :  { %s1205_s8 = sshll.u32 %s1607_s7, 4  ;;  %s1206_s8 = int_to_ptr.vmem [resolvable:$true] %s1205_s8 }
 0x205   :  { %s1575_s0 = scalar_lea.vmem %s1206_s8, 512  ;;  %p1580_p11 = scmp.lt.s32.totalorder %s1206_s8, %s1206_s8 }
 0x206   :  { %p1576_p10 = scmp.ne.s32.totalorder %s1206_s8, %s1575_s0  ;;  %p1581_p12 = scmp.lt.s32.totalorder %s1575_s0, %s1575_s0 }
 0x208   :  { %p1582_p13 = por %p1581_p12, %p1580_p11 }
 0x20a   :  { %p1583_p0 = pnand %p1582_p13, %p1576_p10 }
 0x2c0   :  { %v924_v25 = vpop.f32.mrf.mxu0 }
 0x2c1   :  { %v1001_v26 = vmul.f32 0.001953125, %v924_v25 }
 0x2c2   :  { %v1496_v27 = vpop.f32.mrf.mxu0  ;;  %v997_v28 = vpop.f32.mrf.mxu1 }
 0x2c3   :  { %v1003_v29 = vmul.f32 %v1001_v26, %v1001_v26  ;;  %v1002_v30 = vmul.f32 0.001953125, %v997_v28 }
 0x2c4   :  { %v1515_v31 = vpop.f32.mrf.mxu1 }
 0x2c5   :  { %v1004_v32 = vsub.f32 %v1002_v30, %v1003_v29 }
 0x2c7   :  { %v1005_v33 = vadd.f32 1e-05, %v1004_v32 }
 0x2c9   :  { %1533 = vrsqrt.f32 %v1005_v33 }
 0x2d6   :  { %v1534_v34 = vpop.eup %1533 }
 0x2d7   :  { %v1014_v35 = vmul.f32 %v1534_v34, %v1246_v0 }
 0x2d9   :  { %1519 = vmatmul.mubr.msk.f32.vlgmr.msra.gmra.mxu0 %vm1025_vm6, %v1014_v35  ;;  %v1016_v37 = vmul.f32 %v1014_v35, %v1001_v26 }
 0x2db   :  { %v1023_v38 = vsub.f32 %v1247_v36, %v1016_v37 }
 0x2dd   :  { %1524 = vmatmul.mubr.msk.f32.vlgmr.msra.gmra.mxu1 %vm1025_vm6, %v1023_v38 }
 0x399   :  { %v1099_v42 = vpop.f32.mrf.mxu0 }
 0x39a   :  { %v1179_v43 = vrot.slane %v1099_v42, %v1178_v41 }
 0x39b   :  { %v1520_v44 = vpop.f32.mrf.mxu0 }
 0x39c   :  { %v1180_v45 = vmul.f32 %v1179_v43, %v1826_v51  ;;  %v1181_v47 = vmul.f32 %v1179_v43, %v1823_v49  ;;  %v1182_v48 = vmul.f32 %v1179_v43, %v815_v59  ;;  %v1183_v50 = vmul.f32 %v1179_v43, %v1835_v57 }
 0x39d   :  { %v1172_v46 = vpop.f32.mrf.mxu1 }
 0x39e   :  { %v1187_v52 = vrot.slane %v1172_v46, %v1178_v41 }
 0x39f   :  { %v1525_v53 = vpop.f32.mrf.mxu1 }
 0x3a0   :  { %v1188_v54 = vadd.f32 %v1187_v52, %v1180_v45  ;;  %v1189_v55 = vadd.f32 %v1187_v52, %v1181_v47  ;;  %v1190_v56 = vadd.f32 %v1187_v52, %v1182_v48  ;;  %v1191_v12 = vadd.f32 %v1187_v52, %v1183_v50 }
 0x3a2   :  { %v1192_v58 = vmax.f32 %v1188_v54, 0.0  ;;  %v1193_v9 = vmax.f32 %v1189_v55, 0.0  ;;  %v1194_v60 = vmax.f32 %v1190_v56, 0.0  ;;  %v1195_v61 = vmax.f32 %v1191_v12, 0.0 }
 0x3a4   :  { %1196 = vst.msk [vmem:[#allocation9] sm:$0xff] %vm61_vm0, %v1192_v58  ;;  %1197 = vst.msk [vmem:[#allocation9 + $0x8] sm:$0xff] %vm61_vm0, %v1193_v9 }
 0x3a5   :  { %1198 = vst.msk [vmem:[#allocation9 + $0x10] sm:$0xff] %vm61_vm0, %v1194_v60  ;;  %1199 = vst.msk [vmem:[#allocation9 + $0x18] sm:$0xff] %vm61_vm0, %v1195_v61 }
 0x3a6   :  { %1586 = shalt.err (!%p1583_p0)
}
 0x3a7   :  { %1211 = dma.vmem_to_hbm [thread:$0]  %s1206_s8, 512, %s1886_s9, [#allocation6], %s1602_s12, %s1602_s12, %s1603_s13  }
 0x3a8   :  { %1599 = dma.done.wait [#allocation6], 512  }
 0x3a9   :  { %1600 = vsyncadd [#allocation6], 4294966784 }
 0x3aa   :  { %1215 = vsyncpa [#allocation5], 1 }
 0x3ab   :  { %1216 = vsyncpa [#allocation8], 1 }
 0x3ac   :  { %1217 = vsyncpa [#allocation6], 1 }

</bundles_post_ra>
